<compile_context>
chip_gen: v7x
topology: tpu7x:2x2x1
jax: 0.10.0
libtpu: 0.0.40
codegen_flags: <defaults>
</compile_context>

<pallas_src>
import functools
import math

import jax
import jax.numpy as jnp
import numpy as np
from jax import lax
from jax.experimental import pallas as pl
from jax.experimental.pallas import tpu as pltpu


# ---------------------------------------------------------------------------
# Pallas kernel
# ---------------------------------------------------------------------------
def _rswaf_kernel(x_ref, e_ref, g_ref, out_ref, *, mm_dtype, mm_precision):
    # x_ref  : (TR, P)  native input dtype — P consecutive flattened-x elements/row
    # e_ref  : (P, W)   mm_dtype 0/1 expansion matrix, E[k, c] = (c // G == k)
    # g_ref  : (1, W)   f32 — grid tiled across lanes, g[c] = grid[c % G]
    # out_ref: (TR, W)  lane-dense tile of the FINAL output layout
    lhs = x_ref[...].astype(mm_dtype)                 # in-kernel cast (no wrapper pass)
    x_exp = lax.dot_general(                          # exact lane repeat-by-G via MXU
        lhs, e_ref[...],
        dimension_numbers=(((1,), (0,)), ((), ())),
        preferred_element_type=jnp.float32,
        precision=mm_precision,                       # HIGHEST for f32 (exact), DEFAULT for bf16
    )                                                 # (TR, W): x_exp[r, c] = x[r, c // G]
    # TODO(synk): on v7x, a 3-pass bf16-split or an XLU lane-repeat could replace the
    # HIGHEST f32 matmul if the extended slots ever bind; kept exact & simple here.
    t = jnp.tanh(x_exp - g_ref[...])                  # EUP, f32 math on all generations
    out_ref[...] = (1.0 - t * t).astype(out_ref.dtype)


# ---------------------------------------------------------------------------
# Wrapper
# ---------------------------------------------------------------------------
def _cdiv(a, b):
    return -(-a // b)


def _round_up(v, m):
    return _cdiv(v, m) * m


def _sublane_multiple(dtype):
    return max(8, 32 // np.dtype(dtype).itemsize)     # f32 -> 8, bf16 -> 16, int8 -> 32


def reflectional_switch_forward(x, grid, inv_denominator=None, *, out_dtype=None,
                                vmem_block_budget_bytes=18 * 1024 * 1024):
    """Pallas implementation of ReflectionalSwitchFunction.forward.

    Returns x.shape + (num_grids,). `inv_denominator` is accepted for interface
    fidelity but (exactly like the PyTorch forward) does not affect the output.
    `out_dtype=None` follows torch promotion (result_type(x, grid)); pass
    out_dtype=jnp.bfloat16 explicitly to opt into half-width stores.
    """
    del inv_denominator  # diff_mul is dead code in the PyTorch forward
    orig_shape = x.shape
    G = int(grid.shape[0])
    if out_dtype is None:
        out_dtype = jnp.result_type(x.dtype, grid.dtype)

    # Lane-dense output view: rows of W = P*G lanes, each covering P consecutive x values.
    P = 128 // math.gcd(G, 128)
    W = P * G                                          # multiple of 128

    total = int(x.size)
    xf = jnp.reshape(x, (-1,))                         # native dtype, no astype pass

    rows = _cdiv(total, P)
    padded_total = rows * P
    if padded_total != total:
        # TODO(synk): ragged (total % P != 0) sizes pay a tiny input pad plus a
        # full-output prefix-slice copy; a masked in-kernel tail would avoid it.
        xf = jnp.pad(xf, (0, padded_total - total))
    x2 = xf.reshape(rows, P)

    in_bytes = np.dtype(x.dtype).itemsize
    out_bytes = np.dtype(out_dtype).itemsize
    sub = max(_sublane_multiple(x.dtype), _sublane_multiple(out_dtype))

    # VMEM-budget-driven tile rows.  The (TR, P) input block is lane-padded to 128 in
    # VMEM; blocks are double-buffered by the pipeline.
    bytes_per_row_db = 2 * (128 * in_bytes + W * out_bytes)
    tr_budget = max(sub, (vmem_block_budget_bytes // bytes_per_row_db) // sub * sub)

    if rows >= 2 * sub:
        # At least two (balanced) tiles so v7x megacore can split the parallel axis.
        ntiles = max(2, _cdiv(rows, tr_budget))
        if ntiles % 2:
            ntiles += 1
        tr = max(sub, min(tr_budget, _round_up(_cdiv(rows, ntiles), sub)))
        ntiles = _cdiv(rows, tr)                       # last block may be partial (masked)
    else:
        tr = rows                                      # full-extent block for tiny inputs
        ntiles = 1

    # Expansion matrix / tiled grid (tiny, resident in VMEM).
    is_bf16_in = np.dtype(x.dtype) == np.dtype(jnp.bfloat16)
    mm_dtype = jnp.bfloat16 if is_bf16_in else jnp.float32
    mm_precision = lax.Precision.DEFAULT if is_bf16_in else lax.Precision.HIGHEST

    grid_f = grid.astype(jnp.float32)
    g_tiled = jnp.tile(grid_f, P).reshape(1, W)                       # g_tiled[c] = grid[c % G]
    e_mat = jnp.asarray((np.arange(W)[None, :] // G) == np.arange(P)[:, None],
                        dtype=mm_dtype)                               # (P, W) 0/1

    in_block_vmem = _round_up(tr, sub) * 128 * in_bytes
    out_block_vmem = _round_up(tr, sub) * W * out_bytes
    vmem_needed = 2 * (in_block_vmem + out_block_vmem) + 4 * W * (128 + 8)
    vmem_limit = int(min(max(vmem_needed + (2 << 20), 16 << 20), 30 << 20))

    kernel = functools.partial(_rswaf_kernel, mm_dtype=mm_dtype, mm_precision=mm_precision)

    out2d = pl.pallas_call(
        kernel,
        out_shape=jax.ShapeDtypeStruct((rows, W), out_dtype),
        grid=(ntiles,),
        in_specs=[
            pl.BlockSpec((tr, P), lambda i: (i, 0)),   # x tile (native dtype)
            pl.BlockSpec((P, W), lambda i: (0, 0)),    # expansion matrix (resident)
            pl.BlockSpec((1, W), lambda i: (0, 0)),    # tiled grid (resident)
        ],
        out_specs=pl.BlockSpec((tr, W), lambda i: (i, 0)),
        compiler_params=pltpu.CompilerParams(
            dimension_semantics=("parallel",),
            vmem_limit_bytes=vmem_limit,
        ),
        cost_estimate=pl.CostEstimate(
            flops=5 * G * total,
            transcendentals=G * total,
            bytes_accessed=in_bytes * total + out_bytes * G * total,
        ),
    )(x2, e_mat, g_tiled)

    # (rows, W) row-major IS the flattened x.shape+(G,) layout -> free reshape.
    if padded_total == total:
        return out2d.reshape(orig_shape + (G,))
    out = out2d.reshape(padded_total, G)[:total]
    return out.reshape(orig_shape + (G,))


# ---------------------------------------------------------------------------
# Module-equivalent parameter setup (ReflectionalSwitchFunction.__init__).
# ---------------------------------------------------------------------------
def make_params(grid_min=-1.2, grid_max=0.2, num_grids=8, inv_denominator=0.5):
    grid = jnp.linspace(grid_min, grid_max, num_grids, dtype=jnp.float32)
    inv_den = jnp.float32(inv_denominator)
    return grid, inv_den


def _reference(x, grid):
    diff = x[..., None] - grid
    t = jnp.tanh(diff)
    return 1.0 - t * t


if __name__ == "__main__":
    grid, inv_den = make_params()
    fwd = jax.jit(functools.partial(reflectional_switch_forward,
                                    grid=grid, inv_denominator=inv_den))

    # Main deterministic test (f32, P-divisible -> zero-copy path).
    x = jax.random.normal(jax.random.PRNGKey(0), (2, 4, 16, 16), dtype=jnp.float32)
    out = jax.block_until_ready(fwd(x))
    assert out.shape == x.shape + (grid.shape[0],), out.shape
    assert jnp.allclose(out, _reference(x, grid), atol=1e-5, rtol=1e-5), "f32 mismatch"

    # Ragged size (total % P != 0) -> exercises element pad + partial-block handling.
    xr = jax.random.normal(jax.random.PRNGKey(1), (3, 5, 7), dtype=jnp.float32)
    outr = jax.block_until_ready(fwd(xr))
    assert outr.shape == xr.shape + (grid.shape[0],), outr.shape
    assert jnp.allclose(outr, _reference(xr, grid), atol=1e-5, rtol=1e-5), "ragged mismatch"

    # bf16 input path (native-dtype load, single-pass bf16 expansion; output follows
    # torch promotion -> f32).
    xb = jax.random.normal(jax.random.PRNGKey(2), (4, 32), dtype=jnp.bfloat16)
    outb = jax.block_until_ready(fwd(xb))
    assert outb.shape == xb.shape + (grid.shape[0],), outb.shape
    assert outb.dtype == jnp.float32, outb.dtype
    assert jnp.allclose(outb, _reference(xb.astype(jnp.float32), grid),
                        atol=1e-5, rtol=1e-5), "bf16 mismatch"

    print("KERNEL_OK")
</pallas_src>

<mosaic_0001>
module attributes {stable_mosaic.version = 11 : i64} {
  func.func @_rswaf_kernel(%arg0: i32, %arg1: memref<64x16xf32, #tpu.memory_space<vmem>>, %arg2: memref<16x128xf32, #tpu.memory_space<vmem>>, %arg3: memref<1x128xf32, #tpu.memory_space<vmem>>, %arg4: memref<64x128xf32, #tpu.memory_space<vmem>>) attributes {dimension_semantics = [#tpu.dimension_semantics<parallel>], iteration_bounds = array<i64: 2>, scalar_prefetch = 0 : i64, scratch_operands = 0 : i64, tpu.core_type = #tpu.core_type<tc>, window_params = [{transform_indices = @transform_0, window_bounds = array<i64: 64, 16>}, {pipeline_mode = #tpu.pipeline_mode<synchronous>, transform_indices = @transform_1, window_bounds = array<i64: 16, 128>}, {pipeline_mode = #tpu.pipeline_mode<synchronous>, transform_indices = @transform_2, window_bounds = array<i64: 1, 128>}, {transform_indices = @transform_3, window_bounds = array<i64: 64, 128>}]} {
    %c0 = arith.constant 0 : index
    %c0_0 = arith.constant 0 : index
    %0 = vector.load %arg1[%c0, %c0_0] : memref<64x16xf32, #tpu.memory_space<vmem>>, vector<64x16xf32>
    %c0_1 = arith.constant 0 : index
    %c0_2 = arith.constant 0 : index
    %1 = vector.load %arg2[%c0_1, %c0_2] : memref<16x128xf32, #tpu.memory_space<vmem>>, vector<16x128xf32>
    %cst = arith.constant dense<0.000000e+00> : vector<64x128xf32>
    %2 = tpu.matmul %0, %1, %cst {dimension_numbers = #tpu.dot_dimension_numbers<[1], [0], [0], [1], [0, 0, 1, 1], [], []>, precision = #tpu.contract_precision<fp32>} : vector<64x16xf32>, vector<16x128xf32>, vector<64x128xf32> -> vector<64x128xf32>
    %c0_3 = arith.constant 0 : index
    %c0_4 = arith.constant 0 : index
    %3 = vector.load %arg3[%c0_3, %c0_4] : memref<1x128xf32, #tpu.memory_space<vmem>>, vector<1x128xf32>
    %4 = vector.broadcast %3 : vector<1x128xf32> to vector<64x128xf32>
    %5 = arith.subf %2, %4 : vector<64x128xf32>
    %6 = math.tanh %5 : vector<64x128xf32>
    %7 = arith.mulf %6, %6 : vector<64x128xf32>
    %cst_5 = arith.constant 1.000000e+00 : f32
    %8 = vector.broadcast %cst_5 : f32 to vector<64x128xf32>
    %9 = arith.subf %8, %7 : vector<64x128xf32>
    %c0_6 = arith.constant 0 : index
    %c0_7 = arith.constant 0 : index
    %10 = vector.load %arg4[%c0_6, %c0_7] : memref<64x128xf32, #tpu.memory_space<vmem>>, vector<64x128xf32>
    tpu.vector_store %arg4[%c0_6, %c0_7], %9 {strides = array<i32>} : memref<64x128xf32, #tpu.memory_space<vmem>>, vector<64x128xf32>,
    return
  }
  func.func @transform_0(%arg0: i32) -> (i32, i32) {
    %c0_i32 = arith.constant 0 : i32
    %c0_i32_0 = arith.constant 0 : i32
    return %arg0, %c0_i32 : i32, i32
  }
  func.func @transform_1(%arg0: i32) -> (i32, i32) {
    %c0_i32 = arith.constant 0 : i32
    %c0_i32_0 = arith.constant 0 : i32
    %c0_i32_1 = arith.constant 0 : i32
    return %c0_i32, %c0_i32_0 : i32, i32
  }
  func.func @transform_2(%arg0: i32) -> (i32, i32) {
    %c0_i32 = arith.constant 0 : i32
    %c0_i32_0 = arith.constant 0 : i32
    %c0_i32_1 = arith.constant 0 : i32
    return %c0_i32, %c0_i32_0 : i32, i32
  }
  func.func @transform_3(%arg0: i32) -> (i32, i32) {
    %c0_i32 = arith.constant 0 : i32
    %c0_i32_0 = arith.constant 0 : i32
    return %arg0, %c0_i32 : i32, i32
  }
}

</mosaic_0001>

<bundles_post_ra>
// kernel: tile.7
= control target key start
LH: loop header
LB: loop body
LE: loop exit
PB: predicated region body
PF: predicated region fallthrough
CT: control target
= control target key end

     0   :  { %s131_s10 = smov 120   ;;  %s132_s11 = smov 104   ;;  %vm3_vm0 = vcmask 64512   ;;  %vm9_vm1 = vcmask 1048512   ;;  %vm15_vm2 = vcmask 982912   ;;  %vm21_vm3 = vcmask 917312   ;;  %s207_s0 = inlined_call_operand.vmem [shape: f32[16,8], index: 0, kind: input, shape index: {}]   ;;  %s208_s1 = inlined_call_operand.vmem [shape: f32[1,128], index: 1, kind: output, shape index: {}]  }
   0x1   :  { %v101_v0 = vld [vmem:[%s207_s0 + $0xf] sm:$0x1]   ;;  %v103_v1 = vld [vmem:[%s207_s0 + $0xd] sm:$0x1]   ;;  %v102_v2 = vld [vmem:[%s207_s0 + $0xe] sm:$0x1]  }
   0x2   :  { %7 = vrot.lane.b32.xlu0 %v101_v0, %s131_s10  ;;  %19 = vrot.lane.b32.xlu1 %v103_v1, %s132_s11  ;;  %v104_v3 = vld [vmem:[%s207_s0 + $0xc] sm:$0x1]   ;;  %s133_s16 = smov 112   ;;  %s134_s17 = smov 96   ;;  %v105_v4 = vld [vmem:[%s207_s0 + $0xb] sm:$0x1]  }
   0x3   :  { %v106_v5 = vld [vmem:[%s207_s0 + $0xa] sm:$0x1]   ;;  %v2_v6 = vld [vmem:[%s207_s0] sm:$0x1]   ;;  %s135_s24 = smov 88   ;;  %s136_s25 = smov 80  }
   0x4   :  { %4 = vst.msk [vmem:[#allocation0] sm:$0x1] %vm3_vm0, %v2_v6   ;;  %v107_v7 = vld [vmem:[%s207_s0 + $0x9] sm:$0x1]   ;;  %v108_v8 = vld [vmem:[%s207_s0 + $0x8] sm:$0x1]  }
   0x5   :  { %s137_s30 = smov 72   ;;  %s138_s2 = smov 64   ;;  %v109_v9 = vld [vmem:[%s207_s0 + $0x7] sm:$0x1]   ;;  %v110_v10 = vld [vmem:[%s207_s0 + $0x6] sm:$0x1]  }
   0x6   :  { %13 = vrot.lane.b32.xlu0 %v102_v2, %s133_s16  ;;  %25 = vrot.lane.b32.xlu1 %v104_v3, %s134_s17  ;;  %s139_s7 = smov 56   ;;  %s140_s8 = smov 48   ;;  %v111_v11 = vld [vmem:[%s207_s0 + $0x5] sm:$0x1]   ;;  %v112_v12 = vld [vmem:[%s207_s0 + $0x4] sm:$0x1]  }
   0x7   :  { %s141_s13 = smov 40   ;;  %s142_s14 = smov 32   ;;  %v113_v13 = vld [vmem:[%s207_s0 + $0x3] sm:$0x1]   ;;  %v114_v14 = vld [vmem:[%s207_s0 + $0x2] sm:$0x1]  }
   0x8   :  { %s143_s19 = smov 24   ;;  %s144_s20 = smov 16   ;;  %v115_v15 = vld [vmem:[%s207_s0 + $0x1] sm:$0x1]   ;;  %vm27_vm4 = vcmask 851712   ;;  %vm33_vm5 = vcmask 786112  }
   0x9   :  { %s145_s0 = smov 8   ;;  %vm39_vm6 = vcmask 720512   ;;  %vm45_vm7 = vcmask 654912   ;;  %vm51_vm8 = vcmask 589312   ;;  %vm57_vm9 = vcmask 523712  }
   0xa   :  { %31 = vrot.lane.b32.xlu0 %v105_v4, %s135_s24  ;;  %37 = vrot.lane.b32.xlu1 %v106_v5, %s136_s25  ;;  %vm63_vm10 = vcmask 458112   ;;  %vm69_vm11 = vcmask 392512   ;;  %vm75_vm12 = vcmask 326912   ;;  %vm81_vm13 = vcmask 261312  }
   0xb   :  { %vm87_vm14 = vcmask 195712   ;;  %vm93_vm15 = vcmask 130112  }
   0xe   :  { %43 = vrot.lane.b32.xlu0 %v107_v7, %s137_s30  ;;  %49 = vrot.lane.b32.xlu1 %v108_v8, %s138_s2 }
  0x12   :  { %55 = vrot.lane.b32.xlu0 %v109_v9, %s139_s7  ;;  %61 = vrot.lane.b32.xlu1 %v110_v10, %s140_s8 }
  0x16   :  { %67 = vrot.lane.b32.xlu0 %v111_v11, %s141_s13  ;;  %73 = vrot.lane.b32.xlu1 %v112_v12, %s142_s14 }
  0x1a   :  { %79 = vrot.lane.b32.xlu0 %v113_v13, %s143_s19  ;;  %85 = vrot.lane.b32.xlu1 %v114_v14, %s144_s20 }
  0x1e   :  { %91 = vrot.lane.b32.xlu0 %v115_v15, %s145_s0 }
  0x74   :  { %v8_v16 = vpop.permute.xlu0 %7   ;;  %v20_v17 = vpop.permute.xlu1 %19  }
  0x75   :  { %10 = vst.msk [vmem:[#allocation0] sm:$0x1] %vm9_vm1, %v8_v16  }
  0x78   :  { %v14_v18 = vpop.permute.xlu0 %13   ;;  %v26_v19 = vpop.permute.xlu1 %25  }
  0x79   :  { %16 = vst.msk [vmem:[#allocation0] sm:$0x1] %vm15_vm2, %v14_v18  }
  0x7a   :  { %22 = vst.msk [vmem:[#allocation0] sm:$0x1] %vm21_vm3, %v20_v17  }
  0x7b   :  { %28 = vst.msk [vmem:[#allocation0] sm:$0x1] %vm27_vm4, %v26_v19  }
  0x7c   :  { %v32_v20 = vpop.permute.xlu0 %31   ;;  %v38_v21 = vpop.permute.xlu1 %37  }
  0x7d   :  { %34 = vst.msk [vmem:[#allocation0] sm:$0x1] %vm33_vm5, %v32_v20  }
  0x7e   :  { %40 = vst.msk [vmem:[#allocation0] sm:$0x1] %vm39_vm6, %v38_v21  }
  0x80   :  { %v44_v22 = vpop.permute.xlu0 %43   ;;  %v50_v23 = vpop.permute.xlu1 %49  }
  0x81   :  { %46 = vst.msk [vmem:[#allocation0] sm:$0x1] %vm45_vm7, %v44_v22  }
  0x82   :  { %52 = vst.msk [vmem:[#allocation0] sm:$0x1] %vm51_vm8, %v50_v23  }
  0x84   :  { %v56_v24 = vpop.permute.xlu0 %55   ;;  %v62_v25 = vpop.permute.xlu1 %61  }
  0x85   :  { %58 = vst.msk [vmem:[#allocation0] sm:$0x1] %vm57_vm9, %v56_v24  }
  0x86   :  { %64 = vst.msk [vmem:[#allocation0] sm:$0x1] %vm63_vm10, %v62_v25  }
  0x88   :  { %v68_v26 = vpop.permute.xlu0 %67   ;;  %v74_v27 = vpop.permute.xlu1 %73  }
  0x89   :  { %70 = vst.msk [vmem:[#allocation0] sm:$0x1] %vm69_vm11, %v68_v26  }
  0x8a   :  { %76 = vst.msk [vmem:[#allocation0] sm:$0x1] %vm75_vm12, %v74_v27  }
  0x8c   :  { %v80_v28 = vpop.permute.xlu0 %79   ;;  %v86_v29 = vpop.permute.xlu1 %85  }
  0x8d   :  { %82 = vst.msk [vmem:[#allocation0] sm:$0x1] %vm81_vm13, %v80_v28  }
  0x8e   :  { %88 = vst.msk [vmem:[#allocation0] sm:$0x1] %vm87_vm14, %v86_v29  }
  0x90   :  { %v92_v30 = vpop.permute.xlu0 %91  }
  0x91   :  { %94 = vst.msk [vmem:[#allocation0] sm:$0x1] %vm93_vm15, %v92_v30  }
  0x98   :  { %v98_v31 = vld [vmem:[#allocation0] sm:$0x1] }
  0x99   :  { %100 = vst [vmem:[%s208_s1] sm:$0x1] %v98_v31 }

// kernel: tile.6
= control target key start
LH: loop header
LB: loop body
LE: loop exit
PB: predicated region body
PF: predicated region fallthrough
CT: control target
= control target key end

     0   :  { %s28_s0 = inlined_call_operand.vmem [shape: f32[8], index: 0, kind: input, shape index: {}]   ;;  %s29_s1 = inlined_call_operand.vmem [shape: f32[16,8], index: 1, kind: output, shape index: {}]  }
   0x1   :  { %v4_v0 = vld [vmem:[%s28_s0] ss:$0 sm:$0xff] }
   0x2   :  { %5 = vst [vmem:[%s29_s1] sm:$0xff] %v4_v0  ;;  %8 = vst [vmem:[%s29_s1 + $0x8] sm:$0xff] %v4_v0 }

// kernel: reflectional_switch_forward.1
= control target key start
LH: loop header
LB: loop body
LE: loop exit
PB: predicated region body
PF: predicated region fallthrough
CT: control target
= control target key end

     0   :  { %8 = vsyncpa [#allocation3], 0  ;;  %s1701_s0 = inlined_call_operand.hbm [shape: f32[128,16], index: 0, kind: input, shape index: {}]   ;;  %s1702_s1 = inlined_call_operand.vmem [shape: f32[16,128], index: 1, kind: input, shape index: {}]   ;;  %s1703_s2 = inlined_call_operand.vmem [shape: f32[1,128], index: 2, kind: input, shape index: {}]   ;;  %s1704_s3 = inlined_call_operand.vmem [shape: f32[128,128], index: 3, kind: output, shape index: {}]  }
   0x1   :  { %10 = vsyncpa [#allocation3 + $0x1], 0  ;;  %s1483_s12 = smov 0   ;;  %s1485_s13 = smov 0  }
   0x2   :  { %s1487_s14 = smov 0   ;;  %s1489_s15 = smov 0  }
   0x3 LB: > { %s1102_s16 = sadd.s32 4294967295, %s1458_s15   ;;  %s1503_s17 = sadd.s32 1, %s1458_s15   ;;  %s1458_s15 = sphi %s1489_s15, %s1711_s15   ;;  %s1454_s14 = sphi %s1487_s14, %s1710_s14   ;;  %s1450_s13 = sphi %s1485_s13, %s1709_s13   ;;  %s1446_s12 = sphi %s1483_s12, %s1708_s12  }
   0x4   : > { %s20_s18 = ssub.s32 %s1458_s15, %s1503_s17  ;;  %s23_s19 = sadd.s32 1, %s1454_s14 }
   0x5   : > { %p21_p0 = scmp.eq.s32.totalorder %s20_s18, 0  ;;  %p30_p1 = scmp.ne.s32.totalorder %s1454_s14, %s1450_s13 }
   0x6   : > { %p31_p2 = scmp.eq.s32.totalorder %s1458_s15, 0  ;;  %p36_p3 = scmp.ne.s32.totalorder %s1450_s13, %s1446_s12 }
   0x7   : > { %s1513_s20 = scalar_select %p21_p0, %s1454_s14, %s23_s19  }
   0x8   : > { %p32_p4 = por %p31_p2, %p30_p1  ;;  %p37_p5 = scmp.eq.s32.totalorder %s1102_s16, 0 }
   0x9   : > { %p1343_p6 = scmp.lt.s32.totalorder %s1458_s15, 2  ;;  %s134_s22 = sand.u32 1, %s1454_s14  }
   0xa   : > { %p1518_p7 = por %p37_p5, %p36_p3  ;;  %s1106_s23 = sshll.u32 %s134_s22, 6 }
   0xb   : > { %s1116_s24 = sshll.u32 %s1458_s15, 10  ;;  %s138_s28 = scalar_lea.vmem [#allocation2], %s1106_s23 }
   0xc   : > { %s1527_s27 = scalar_lea.hbm %s1701_s0, %s1116_s24  ;;  %s145_s29 = sshll.u32 %s138_s28, 4  ;;  %s1529_s29 = int_to_ptr.vmem [resolvable:$true] %s145_s29 }
   0xd   : > { %p1531_p8 = pnand %p1343_p6, %p32_p4  ;;  %s1536_s4 = scalar_lea.sflag [#allocation3], %s134_s22 }
   0xe   : > { %s1394_s5 = scalar_lea.hbm %s1527_s27, 1024  ;;  %s1399_s8 = scalar_lea.hbm %s1701_s0, 2048 }
   0xf   : > { %p1395_p10 = scmp.ne.s32.totalorder %s1527_s27, %s1394_s5  ;;  %p1396_p11 = pneg %p1531_p8 }
  0x10   : > { %p1400_p0 = scmp.lt.u32.totalorder %s1527_s27, %s1701_s0  ;;  %p1401_p1 = scmp.lt.u32.totalorder %s1399_s8, %s1394_s5 }
  0x11   : > { %p1397_p12 = pnand %p1396_p11, %p1395_p10  ;;  %p1403_p3 = scmp.lt.u32.totalorder %s1394_s5, %s1527_s27 }
  0x12   : > { %p1402_p2 = por %p1401_p1, %p1400_p0 }
  0x13   : > { %p1398_p13 = pneg %p1397_p12 }
  0x14   : > { %p1404_p4 = por %p1403_p3, %p1402_p2 }
  0x16   : > { %p1405_p5 = pnand %p1404_p4, %p1398_p13 }
  0x18   : > { %1408 = shalt.err (!%p1405_p5)
}
  0x19   : > { %s1409_s11 = scalar_lea.vmem %s1529_s29, 1024  ;;  %s1460_s12 = smov [#allocation2]  }
  0x1a   : > { %p1410_p6 = scmp.ne.s32.totalorder %s1529_s29, %s1409_s11  ;;  %s1414_s18 = sshll.u32 %s1460_s12, 4  ;;  %s1415_s18 = int_to_ptr.vmem [resolvable:$false] %s1414_s18 }
  0x1b   : > { %s1416_s19 = scalar_lea.vmem %s1415_s18, 2048  ;;  %p1417_p9 = scmp.lt.s32.totalorder %s1529_s29, %s1415_s18 }
  0x1c   : > { %p1412_p10 = pnand %p1410_p6, %p1396_p11  ;;  %p1418_p0 = scmp.lt.s32.totalorder %s1416_s19, %s1409_s11 }
  0x1e   : > { %p1413_p12 = pneg %p1412_p10  ;;  %p1419_p1 = por %p1418_p0, %p1417_p9 }
  0x20   : > { %p1420_p2 = pnand %p1419_p1, %p1413_p12 }
  0x22   : > { %1423 = shalt.err (!%p1420_p2)
}
  0x23   : > { %s1461_s22 = smov 128   ;;  %s1462_s23 = smov 8  }
  0x24   : > { %1342 = dma.hbm_to_vmem [thread:$0]  (!%p1531_p8), %s1527_s27, 1024, %s1529_s29, %s1536_s4, %s1461_s22, %s1461_s22, %s1462_s23  }
  0x25   : > { %p153_p11 = scmp.lt.s32.totalorder %s1458_s15, 3  ;;  %p1707_p13 = scmp.ge.s32.totalorder %s1458_s15, 1 }
  0x27   : > { %p154_p3 = pnand %p1707_p13, %p153_p11 }
  0x28   : > { %s159_s24 = sand.u32 (!%p154_p3), 1, %s1450_s13  }
  0x29   : > { %157 = sbr.rel (%p154_p3) target bundleno = 340 (0x154), region = 32  ;;  %s1110_s25 = sshll.u32 (!%p154_p3), %s159_s24, 6 }
  0x2a   : > { %s160_s26 = scalar_lea.sflag (!%p154_p3), [#allocation3], %s159_s24  ;;  %s1568_s28 = scalar_lea.vmem (!%p154_p3), [#allocation2], %s1110_s25 }
  0x30   : > { %1441 = dma.done.wait (%p1518_p7), %s160_s26, 1024  }
  0x31   : > { %1443 = vsyncadd (%p1518_p7), %s160_s26, 4294966272  ;;  %vm203_vm0 = vcmask 130048   ;;  %v201_v0 = vld [vmem:[%s1702_s1] sm:$0xff]  ;;  %v202_v1 = vld [vmem:[%s1702_s1 + $0x8] sm:$0xff]  ;;  %s1111_s6 = sshll.u32 %s1102_s16, 3 }
  0x32   : > { %v193_v2 = vld [vmem:[%s1568_s28] sm:$0xff]  ;;  %v229_v3 = vand.u32 4294901760, %v201_v0  ;;  %v232_v4 = vand.u32 4294901760, %v202_v1  ;;  %v194_v6 = vld [vmem:[%s1568_s28 + $0x8] sm:$0xff]  ;;  %v195_v7 = vld [vmem:[%s1568_s28 + $0x10] sm:$0xff]  ;;  %p188_p7 = scmp.lt.s32.totalorder %s1111_s6, 15 }
  0x33   : > { %v205_v5 = vsel %vm203_vm0, %v193_v2, 0  ;;  %v196_v8 = vld [vmem:[%s1568_s28 + $0x18] sm:$0xff]  ;;  %v208_v10 = vsel %vm203_vm0, %v194_v6, 0  ;;  %v211_v11 = vsel %vm203_vm0, %v195_v7, 0  ;;  %v197_v13 = vld [vmem:[%s1568_s28 + $0x20] sm:$0xff]  ;;  %v198_v18 = vld [vmem:[%s1568_s28 + $0x28] sm:$0xff] }
  0x34   : > { %v1585_v9 = vand.u32 4294901760, %v205_v5  ;;  %v214_v12 = vsel %vm203_vm0, %v196_v8, 0  ;;  %v1591_v14 = vpack.c.bf16 %v232_v4, %v229_v3  ;;  %v1593_v15 = vand.u32 4294901760, %v208_v10  ;;  %v199_v39 = vld [vmem:[%s1568_s28 + $0x30] sm:$0xff]  ;;  %v200_v48 = vld [vmem:[%s1568_s28 + $0x38] sm:$0xff]  ;;  %s1713_s6 = smov (!%p188_p7, %s1111_s6), 15 }
  0x35   : > { %v1595_v16 = vand.u32 4294901760, %v211_v11  ;;  %v377_v17 = vsub.f32 %v201_v0, %v229_v3  ;;  %v384_v20 = vsub.f32 %v202_v1, %v232_v4  ;;  %v1601_v21 = vand.u32 4294901760, %v214_v12  ;;  %s1112_s15 = sshll.u32 %s1713_s6, 3 }
  0x36   : > { %v1599_v19 = vsub.f32 %v205_v5, %v1585_v9  ;;  %v217_v22 = vsel %vm203_vm0, %v197_v13, 0  ;;  %1286 = vmatprep.subr.bf16.mxu0 %v1591_v14  ;;  %1274 = vmatprep.subr.bf16.mxu1 %v1591_v14  ;;  %v1607_v23 = vsub.f32 %v208_v10, %v1593_v15  ;;  %v220_v30 = vsel %vm203_vm0, %v198_v18, 0  ;;  %s1678_s8 = scalar_lea.vmem %s1704_s3, %s1112_s15 }
  0x37   : > { %v1610_v24 = vsub.f32 %v211_v11, %v1595_v16  ;;  %v378_v25 = vand.u32 4294901760, %v377_v17  ;;  %v1612_v26 = vand.u32 4294901760, %v217_v22  ;;  %1288 = vmatpush3.bf16.msra.mxu0 %v1591_v14  ;;  %1276 = vmatpush3.bf16.msra.mxu1 %v1591_v14  ;;  %v385_v28 = vand.u32 4294901760, %v384_v20  ;;  %v1113_v11 = vld [vmem:[%s1703_s2] ss:$0 sm:$0xff] }
  0x38   : > { %v297_v27 = vand.u32 4294901760, %v1599_v19  ;;  %v1618_v29 = vsub.f32 %v214_v12, %v1601_v21  ;;  %v307_v31 = vand.u32 4294901760, %v1607_v23  ;;  %v1633_v47 = vand.u32 4294901760, %v220_v30 }
  0x39   : > { %v317_v32 = vand.u32 4294901760, %v1610_v24  ;;  %v379_v33 = vsub.f32 %v377_v17, %v378_v25  ;;  %v1624_v34 = vsub.f32 %v217_v22, %v1612_v26  ;;  %v386_v36 = vsub.f32 %v384_v20, %v385_v28 }
  0x3a   : > { %1229 = vmatprep.mubr.f32.mxu0 %v297_v27  ;;  %v298_v35 = vsub.f32 %v1599_v19, %v297_v27  ;;  %v327_v37 = vand.u32 4294901760, %v1618_v29  ;;  %v1289_v38 = vpack.c.bf16 %v385_v28, %v378_v25  ;;  %v308_v40 = vsub.f32 %v1607_v23, %v307_v31 }
  0x3b   : > { %1230 = vmatmul.mubr.f32.vlgmr.msra.gmra.mrb[0].mxu0 %v307_v31  ;;  %v380_v41 = vand.u32 4294901760, %v379_v33  ;;  %v318_v42 = vsub.f32 %v1610_v24, %v317_v32  ;;  %v337_v43 = vand.u32 4294901760, %v1624_v34  ;;  %v387_v45 = vand.u32 4294901760, %v386_v36 }
  0x3c   : > { %v299_v44 = vand.u32 4294901760, %v298_v35  ;;  %1232 = vmatprep.mubr.f32.mxu0 %v317_v32  ;;  %1290 = vmatprep.subr.bf16.mxu0 %v1289_v38  ;;  %v328_v46 = vsub.f32 %v1618_v29, %v327_v37  ;;  %v309_v49 = vand.u32 4294901760, %v308_v40  ;;  %v223_v52 = vsel %vm203_vm0, %v199_v39, 0 }
  0x3d   : > { %1292 = vmatpush3.bf16.msra.mxu0 %v1289_v38  ;;  %v319_v50 = vand.u32 4294901760, %v318_v42  ;;  %v338_v51 = vsub.f32 %v1624_v34, %v337_v43  ;;  %v1277_v53 = vpack.c.bf16 %v387_v45, %v380_v41  ;;  %v1639_v54 = vsub.f32 %v220_v30, %v1633_v47 }
  0x3e   : > { %1181 = vmatprep.mubr.f32.mxu1 %v299_v44  ;;  %v355_v55 = vand.u32 4294901760, %v223_v52  ;;  %1294 = vmatprep.subr.bf16.mxu0 %v1591_v14  ;;  %v329_v56 = vand.u32 4294901760, %v328_v46  ;;  %v226_v57 = vsel %vm203_vm0, %v200_v48, 0  ;;  %v1281_v58 = vpack.c.bf16 %v384_v20, %v377_v17 }
  0x3f   : > { %1182 = vmatmul.mubr.f32.vlgmr.msra.gmra.mrb[0].mxu1 %v309_v49  ;;  %1233 = vmatmul.mubr.f32.gmra.mrb[2].mxu0 %v327_v37  ;;  %v347_v59 = vand.u32 4294901760, %v1639_v54  ;;  %v339_v60 = vand.u32 4294901760, %v338_v51  ;;  %v365_v62 = vand.u32 4294901760, %v226_v57 }
  0x40   : > { %1278 = vmatprep.subr.bf16.mxu1 %v1277_v53  ;;  %1184 = vmatprep.mubr.f32.mxu1 %v319_v50  ;;  %v356_v61 = vsub.f32 %v223_v52, %v355_v55 }
  0x41   : > { %1280 = vmatpush3.bf16.msra.mxu1 %v1277_v53  ;;  %1235 = vmatprep.mubr.f32.mxu0 %v337_v43  ;;  %v348_v0 = vsub.f32 %v1639_v54, %v347_v59  ;;  %v366_v1 = vsub.f32 %v226_v57, %v365_v62 }
  0x42   : > { %v357_v63 = vand.u32 4294901760, %v356_v61  ;;  %1282 = vmatprep.subr.bf16.mxu1 %v1281_v58 }
  0x43   : > { %1185 = vmatmul.mubr.f32.gmra.mrb[2].mxu1 %v329_v56  ;;  %1236 = vmatmul.mubr.f32.gmra.mrb[4].mxu0 %v347_v59  ;;  %v349_v2 = vand.u32 4294901760, %v348_v0  ;;  %v367_v3 = vand.u32 4294901760, %v366_v1 }
  0x44   : > { %1187 = vmatprep.mubr.f32.mxu1 %v339_v60  ;;  %1238 = vmatprep.mubr.f32.mxu0 %v357_v63  ;;  %v358_v4 = vsub.f32 %v356_v61, %v357_v63 }
  0x45   : > { %v368_v6 = vsub.f32 %v366_v1, %v367_v3 }
  0x46   : > { %v359_v5 = vand.u32 4294901760, %v358_v4 }
  0x47   : > { %1188 = vmatmul.mubr.f32.gmra.mrb[4].mxu1 %v349_v2  ;;  %1239 = vmatmul.mubr.f32.gmra.mrb[6].mxu0 %v367_v3  ;;  %v369_v7 = vand.u32 4294901760, %v368_v6 }
  0x48   : > { %1190 = vmatprep.mubr.f32.mxu1 %v359_v5  ;;  %1245 = vmatprep.mubr.f32.mxu0 %v1585_v9 }
  0x4b   : > { %1191 = vmatmul.mubr.f32.gmra.mrb[6].mxu1 %v369_v7  ;;  %1246 = vmatmul.mubr.f32.vlgmr.msra.gmra.mrb[0].mxu0 %v1593_v15 }
  0x4c   : > { %1197 = vmatprep.mubr.f32.mxu1 %v1585_v9  ;;  %1248 = vmatprep.mubr.f32.mxu0 %v1595_v16 }
  0x4d   : > { %1296 = vmatpush3.bf16.msra.mxu0 %v1591_v14 }
  0x4f   : > { %1198 = vmatmul.mubr.f32.vlgmr.msra.gmra.mrb[0].mxu1 %v1593_v15  ;;  %1249 = vmatmul.mubr.f32.gmra.mrb[2].mxu0 %v1601_v21 }
  0x50   : > { %1284 = vmatpush3.bf16.msra.mxu1 %v1281_v58  ;;  %1200 = vmatprep.mubr.f32.mxu1 %v1595_v16 }
  0x51   : > { %1251 = vmatprep.mubr.f32.mxu0 %v1612_v26 }
  0x53   : > { %1201 = vmatmul.mubr.f32.gmra.mrb[2].mxu1 %v1601_v21  ;;  %1252 = vmatmul.mubr.f32.gmra.mrb[4].mxu0 %v1633_v47 }
  0x54   : > { %1203 = vmatprep.mubr.f32.mxu1 %v1612_v26  ;;  %1254 = vmatprep.mubr.f32.mxu0 %v355_v55 }
  0x57   : > { %1204 = vmatmul.mubr.f32.gmra.mrb[4].mxu1 %v1633_v47  ;;  %1255 = vmatmul.mubr.f32.gmra.mrb[6].mxu0 %v365_v62 }
  0x58   : > { %1206 = vmatprep.mubr.f32.mxu1 %v355_v55  ;;  %1261 = vmatprep.mubr.f32.mxu0 %v1585_v9 }
  0x5b   : > { %1207 = vmatmul.mubr.f32.gmra.mrb[6].mxu1 %v365_v62  ;;  %1262 = vmatmul.mubr.f32.vlgmr.msra.gmra.mrb[0].mxu0 %v1593_v15 }
  0x5c   : > { %1213 = vmatprep.mubr.f32.mxu1 %v1599_v19  ;;  %1264 = vmatprep.mubr.f32.mxu0 %v1595_v16 }
  0x5f   : > { %1214 = vmatmul.mubr.f32.vlgmr.msra.gmra.mrb[0].mxu1 %v1607_v23  ;;  %1265 = vmatmul.mubr.f32.gmra.mrb[2].mxu0 %v1601_v21 }
  0x60   : > { %1216 = vmatprep.mubr.f32.mxu1 %v1610_v24  ;;  %1267 = vmatprep.mubr.f32.mxu0 %v1612_v26 }
  0x63   : > { %1217 = vmatmul.mubr.f32.gmra.mrb[2].mxu1 %v1618_v29  ;;  %1268 = vmatmul.mubr.f32.gmra.mrb[4].mxu0 %v1633_v47 }
  0x64   : > { %1219 = vmatprep.mubr.f32.mxu1 %v1624_v34  ;;  %1270 = vmatprep.mubr.f32.mxu0 %v355_v55 }
  0x67   : > { %1220 = vmatmul.mubr.f32.gmra.mrb[4].mxu1 %v1639_v54  ;;  %1271 = vmatmul.mubr.f32.gmra.mrb[6].mxu0 %v365_v62 }
  0x68   : > { %1222 = vmatprep.mubr.f32.mxu1 %v356_v61 }
  0x6b   : > { %1223 = vmatmul.mubr.f32.gmra.mrb[6].mxu1 %v366_v1 }
 0x12e   : > { %v1263_v8 = vpop.f32.mrb[0].mxu0 }
 0x12f   : > { %v942_v9 = vpop.f32.mrb[1].mxu0 }
 0x132   : > { %v1215_v10 = vpop.f32.mrb[0].mxu1  ;;  %v1266_v12 = vpop.f32.mrb[2].mxu0 }
 0x133   : > { %v1297_v13 = vadd.f32 %v1263_v8, %v1215_v10  ;;  %v570_v14 = vpop.f32.mrb[1].mxu1  ;;  %v954_v15 = vpop.f32.mrb[3].mxu0 }
 0x134   : > { %v1298_v16 = vadd.f32 %v942_v9, %v570_v14 }
 0x135   : > { %v996_v17 = vsub.f32 %v1297_v13, %v1113_v11 }
 0x136   : > { %v995_v18 = vsub.f32 %v1298_v16, %v1113_v11  ;;  %v1218_v19 = vpop.f32.mrb[2].mxu1  ;;  %v1269_v20 = vpop.f32.mrb[4].mxu0 }
 0x137   : > { %1378 = vtanh.f32 %v996_v17  ;;  %v1299_v21 = vadd.f32 %v1266_v12, %v1218_v19  ;;  %v584_v22 = vpop.f32.mrb[3].mxu1  ;;  %v966_v23 = vpop.f32.mrb[5].mxu0 }
 0x138   : > { %1380 = vtanh.f32 %v995_v18  ;;  %v1300_v24 = vadd.f32 %v954_v15, %v584_v22 }
 0x139   : > { %v998_v25 = vsub.f32 %v1299_v21, %v1113_v11 }
 0x13a   : > { %v997_v26 = vsub.f32 %v1300_v24, %v1113_v11  ;;  %v1221_v27 = vpop.f32.mrb[4].mxu1  ;;  %v1272_v28 = vpop.f32.mrb[6].mxu0 }
 0x13b   : > { %1382 = vtanh.f32 %v998_v25  ;;  %v1301_v29 = vadd.f32 %v1269_v20, %v1221_v27  ;;  %v598_v30 = vpop.f32.mrb[5].mxu1  ;;  %v978_v31 = vpop.f32.mrb[7].mxu0 }
 0x13c   : > { %1384 = vtanh.f32 %v997_v26  ;;  %v1302_v32 = vadd.f32 %v966_v23, %v598_v30 }
 0x13d   : > { %v1000_v33 = vsub.f32 %v1301_v29, %v1113_v11 }
 0x13e   : > { %v999_v34 = vsub.f32 %v1302_v32, %v1113_v11  ;;  %v1224_v35 = vpop.f32.mrb[6].mxu1 }
 0x13f   : > { %1386 = vtanh.f32 %v1000_v33  ;;  %v1303_v36 = vadd.f32 %v1272_v28, %v1224_v35  ;;  %v612_v37 = vpop.f32.mrb[7].mxu1 }
 0x140   : > { %1388 = vtanh.f32 %v999_v34  ;;  %v1304_v38 = vadd.f32 %v978_v31, %v612_v37 }
 0x141   : > { %v1379_v39 = vpop.eup %1378  ;;  %v1002_v40 = vsub.f32 %v1303_v36, %v1113_v11 }
 0x142   : > { %v1381_v41 = vpop.eup %1380  ;;  %v1012_v42 = vmul.f32 %v1379_v39, %v1379_v39  ;;  %v1001_v43 = vsub.f32 %v1304_v38, %v1113_v11 }
 0x143   : > { %v1011_v44 = vmul.f32 %v1381_v41, %v1381_v41  ;;  %1390 = vtanh.f32 %v1002_v40 }
 0x144   : > { %v1020_v45 = vsub.f32 1.0, %v1012_v42  ;;  %1392 = vtanh.f32 %v1001_v43 }
 0x145   : > { %v1383_v46 = vpop.eup %1382  ;;  %v1019_v47 = vsub.f32 1.0, %v1011_v44 }
 0x146   : > { %v1385_v48 = vpop.eup %1384  ;;  %1028 = vst [vmem:[%s1678_s8 + $0x8] sm:$0xff] %v1020_v45  ;;  %v1014_v49 = vmul.f32 %v1383_v46, %v1383_v46 }
 0x147   : > { %1027 = vst [vmem:[%s1678_s8] sm:$0xff] %v1019_v47  ;;  %v1013_v50 = vmul.f32 %v1385_v48, %v1385_v48 }
 0x148   : > { %v1022_v51 = vsub.f32 1.0, %v1014_v49 }
 0x149   : > { %v1387_v52 = vpop.eup %1386  ;;  %v1021_v53 = vsub.f32 1.0, %v1013_v50 }
 0x14a   : > { %v1389_v54 = vpop.eup %1388  ;;  %1030 = vst [vmem:[%s1678_s8 + $0x18] sm:$0xff] %v1022_v51  ;;  %v1016_v55 = vmul.f32 %v1387_v52, %v1387_v52 }
 0x14b   : > { %1029 = vst [vmem:[%s1678_s8 + $0x10] sm:$0xff] %v1021_v53  ;;  %v1015_v56 = vmul.f32 %v1389_v54, %v1389_v54 }
 0x14c   : > { %v1024_v57 = vsub.f32 1.0, %v1016_v55 }
 0x14d   : > { %v1391_v58 = vpop.eup %1390  ;;  %v1023_v59 = vsub.f32 1.0, %v1015_v56 }
 0x14e   : > { %v1393_v60 = vpop.eup %1392  ;;  %1032 = vst [vmem:[%s1678_s8 + $0x28] sm:$0xff] %v1024_v57  ;;  %v1018_v61 = vmul.f32 %v1391_v58, %v1391_v58 }
 0x14f   : > { %1031 = vst [vmem:[%s1678_s8 + $0x20] sm:$0xff] %v1023_v59  ;;  %v1017_v62 = vmul.f32 %v1393_v60, %v1393_v60 }
 0x150   : > { %v1026_v63 = vsub.f32 1.0, %v1018_v61 }
 0x151   : > { %v1025_v0 = vsub.f32 1.0, %v1017_v62 }
 0x152   : > { %1034 = vst [vmem:[%s1678_s8 + $0x38] sm:$0xff] %v1026_v63 }
 0x153   : > { %1033 = vst [vmem:[%s1678_s8 + $0x30] sm:$0xff] %v1025_v0 }
 0x154 PF: > { %p13_p8 = scmp.ge.s32.totalorder %s1503_s17, 4   ;;  %s1708_s12 = smov %s1450_s13 }
 0x155   : > { %s1709_s13 = smov %s1454_s14  ;;  %s1710_s14 = smov %s1513_s20 }
 0x156   : > { %s1711_s15 = smov %s1503_s17  ;;  %15 = sbr.rel (!%p13_p8) target bundleno = 3 (0x3), region = 72 }
 0x15d   :  { %1057 = vsyncpa [#allocation3], 1 }
 0x15e   :  { %1059 = vsyncpa [#allocation3 + $0x1], 1 }

</bundles_post_ra>
